<compile_context>
chip_gen: v5e
topology: v5e:2x2
jax: 0.10.0
libtpu: 0.0.40
codegen_flags: <defaults>
</compile_context>

<pallas_src>
import functools

import jax
import jax.numpy as jnp
from jax.experimental import pallas as pl
from jax.experimental.pallas import tpu as pltpu

EPS = 1e-5                   # PyTorch BatchNorm1d default
_MAX_SINGLE_TILE = 4096      # whole batch as one block at/below this many rows
_TILE_ROWS_LARGE = 4096      # streamed row tile above it


def _vmem_budget_bytes():
    """Generation-aware scoped-VMEM budget: ~3/4 of physical VMEM
    (v7x: 64 MiB -> 48 MiB; v5e/v6e: 128 MiB -> 96 MiB).  Falls back to the v7x-safe value."""
    try:
        cap = pltpu.get_tpu_info().vmem_capacity_bytes
    except Exception:
        cap = 64 * 1024 * 1024
    return int(cap) * 3 // 4


def _simple_nn_kernel(x_ref, w1_ref, b1_ref, g1_ref, bt1_ref,
                      w2_ref, b2_ref, g2_ref, bt2_ref, w3_ref, b3_ref,
                      o_ref,
                      h1_scr, h2_scr, s1_scr, s2_scr, *,
                      tile_rows, batch_size, n_tiles, need_mask, fused):
    p = pl.program_id(0)          # phase: 0=layer1+BN1 stats, 1=layer2+BN2 stats, 2=head
    i = pl.program_id(1)          # batch tile
    last = n_tiles - 1
    inv_n = 1.0 / batch_size
    row0 = pl.multiple_of(i * tile_rows, tile_rows)

    # ---- tiny traced helpers (inlined at call sites) ------------------------------------
    def layer1():
        # K = input_dim is tiny, so this matmul stays f32 for accuracy (not MXU-bound).
        h = jnp.dot(x_ref[...].astype(jnp.float32), w1_ref[...],
                    preferred_element_type=jnp.float32)
        return jnp.maximum(h + b1_ref[...], 0.0)

    def bn1_bf16(h1_f32):
        # BN1 (scale, shift) live in s1_scr rows 0/1 once phase 0 has finished.
        return (h1_f32 * s1_scr[0:1, :] + s1_scr[1:2, :]).astype(jnp.bfloat16)

    def layer2(h1n_bf16):
        h = jnp.dot(h1n_bf16, w2_ref[...], preferred_element_type=jnp.float32)
        return jnp.maximum(h + b2_ref[...], 0.0)

    def accum_stats(s_ref, h):
        # Single-pass sum / sum-of-squares in f32 (mean / biased var derived at phase end).
        def add(hm):
            s_ref[0:1, :] += jnp.sum(hm, axis=0, keepdims=True)
            s_ref[1:2, :] += jnp.sum(hm * hm, axis=0, keepdims=True)

        if not need_mask:
            add(h)
        else:
            # Padded rows only exist in the last tile; mask is gated there (free elsewhere).
            @pl.when(i < last)
            def _():
                add(h)

            @pl.when(i == last)
            def _():
                rows = jax.lax.broadcasted_iota(jnp.int32, (tile_rows, 1), 0)
                add(jnp.where(rows < batch_size - last * tile_rows, h, 0.0))

    def finalize_bn(s_ref, g_ref, bt_ref):
        # (sum, sumsq) -> (scale, shift) in place.  Training-mode BatchNorm1d:
        # batch mean, biased variance, eps=1e-5, then affine gamma/beta.
        mu = s_ref[0:1, :] * inv_n
        var = jnp.maximum(s_ref[1:2, :] * inv_n - mu * mu, 0.0)
        scale = g_ref[...] * jax.lax.rsqrt(var + EPS)
        s_ref[0:1, :] = scale
        s_ref[1:2, :] = bt_ref[...] - mu * scale

    # ---- phase 0: h1 = relu(x @ W1 + b1), accumulate BN1 statistics ----------------------
    @pl.when(p == 0)
    def _phase0():
        @pl.when(i == 0)
        def _():
            s1_scr[...] = jnp.zeros_like(s1_scr)
            s2_scr[...] = jnp.zeros_like(s2_scr)

        h1 = layer1()
        accum_stats(s1_scr, h1)
        if fused:
            h1_scr[pl.ds(row0, tile_rows), :] = h1.astype(jnp.bfloat16)

        @pl.when(i == last)
        def _():
            finalize_bn(s1_scr, g1_ref, bt1_ref)

        o_ref[...] = jnp.zeros_like(o_ref)   # placeholder; overwritten in phase 2

    # ---- phase 1: h2 = relu(bn1(h1) @ W2 + b2), accumulate BN2 statistics ----------------
    @pl.when(p == 1)
    def _phase1():
        if fused:
            h1 = h1_scr[pl.ds(row0, tile_rows), :].astype(jnp.float32)
        else:
            h1 = layer1()                    # recompute-from-x fallback (x re-streamed)
        h2 = layer2(bn1_bf16(h1))
        accum_stats(s2_scr, h2)
        if fused:
            h2_scr[pl.ds(row0, tile_rows), :] = h2.astype(jnp.bfloat16)

        @pl.when(i == last)
        def _():
            finalize_bn(s2_scr, g2_ref, bt2_ref)

        o_ref[...] = jnp.zeros_like(o_ref)

    # ---- phase 2: y = bn2(h2) . w3 + b3  (VPU mul + XLU reduce, lane-dense (1,TB) store) --
    @pl.when(p == 2)
    def _phase2():
        if fused:
            h2 = h2_scr[pl.ds(row0, tile_rows), :].astype(jnp.float32)
        else:
            h2 = layer2(bn1_bf16(layer1()))
        h2n = h2 * s2_scr[0:1, :] + s2_scr[1:2, :]
        y = jnp.sum(h2n * w3_ref[...], axis=-1)
        o_ref[...] = y[None, :] + b3_ref[...]


def simple_nn_forward(x, params):
    batch_size, input_dim = x.shape

    if batch_size <= _MAX_SINGLE_TILE:
        tile_rows, padded_rows = batch_size, batch_size     # one full-array block, no padding
    else:
        tile_rows = _TILE_ROWS_LARGE
        padded_rows = pl.cdiv(batch_size, tile_rows) * tile_rows
    n_tiles = padded_rows // tile_rows
    need_mask = padded_rows != batch_size

    # Fused-path residency check (h1 + h2 bf16 in VMEM) against a generation-aware budget.
    budget = _vmem_budget_bytes()
    resident_bytes = padded_rows * (128 + 64) * 2
    pipeline_bytes = (2 * tile_rows * input_dim * 4          # double-buffered x tiles (f32)
                      + 2 * tile_rows * 4                    # double-buffered output tiles
                      + tile_rows * (128 + 64) * 4           # live f32 intermediates
                      + (2 << 20))                           # params + slack
    fused = resident_bytes + pipeline_bytes <= budget

    # Only the large, non-tile-divisible case needs a wrapper-side pad (x stays f32; cast in-kernel).
    xp = x if not need_mask else jnp.pad(x, ((0, padded_rows - batch_size), (0, 0)))

    w2 = params["w2"].astype(jnp.bfloat16)   # tiny (128, 64): bf16 MXU operand
    w3 = params["w3"].reshape(1, 64)         # (64, 1) -> lane-dense row for the VPU head

    kernel = functools.partial(
        _simple_nn_kernel, tile_rows=tile_rows, batch_size=batch_size,
        n_tiles=n_tiles, need_mask=need_mask, fused=fused)

    if fused:
        # x is only consumed in phase 0; pin its block index to 0 afterwards so the
        # pipeline skips re-fetching it (block index unchanged across consecutive steps).
        def x_map(p, i):
            return (i * (1 - jnp.minimum(p, 1)), 0)
        h1_shape, h2_shape = (padded_rows, 128), (padded_rows, 64)
    else:
        def x_map(p, i):
            return (i, 0)
        h1_shape, h2_shape = (8, 128), (8, 128)   # unused dummies in recompute mode

    res = lambda p, i: (0, 0)                     # params / resident blocks

    y = pl.pallas_call(
        kernel,
        grid=(3, n_tiles),
        in_specs=[
            pl.BlockSpec((tile_rows, input_dim), x_map),   # activations: streamed
            pl.BlockSpec((input_dim, 128), res),           # W1 (f32)
            pl.BlockSpec((1, 128), res),                   # b1
            pl.BlockSpec((1, 128), res),                   # BN1 gamma
            pl.BlockSpec((1, 128), res),                   # BN1 beta
            pl.BlockSpec((128, 64), res),                  # W2 (bf16)
            pl.BlockSpec((1, 64), res),                    # b2
            pl.BlockSpec((1, 64), res),                    # BN2 gamma
            pl.BlockSpec((1, 64), res),                    # BN2 beta
            pl.BlockSpec((1, 64), res),                    # w3 row
            pl.BlockSpec((1, 1), res),                     # b3
        ],
        out_specs=pl.BlockSpec((1, tile_rows), lambda p, i: (0, i)),
        out_shape=jax.ShapeDtypeStruct((1, padded_rows), jnp.float32),
        scratch_shapes=[
            pltpu.VMEM(h1_shape, jnp.bfloat16),            # resident h1 (fused path)
            pltpu.VMEM(h2_shape, jnp.bfloat16),            # resident h2 (fused path)
            pltpu.VMEM((2, 128), jnp.float32),             # BN1 sum/sumsq -> scale/shift
            pltpu.VMEM((2, 64), jnp.float32),              # BN2 sum/sumsq -> scale/shift
        ],
        compiler_params=pltpu.CompilerParams(
            # Both axes carry cross-step state (BN stats, phase ordering) -> "arbitrary".
            dimension_semantics=("arbitrary", "arbitrary"),
            vmem_limit_bytes=budget,
        ),
    )(xp, params["w1"], params["b1"], params["g1"], params["bt1"],
      w2, params["b2"], params["g2"], params["bt2"], w3, params["b3"])

    return y.reshape(-1)[:batch_size]   # == .squeeze(-1) of PyTorch's (B, 1) output


def init_params(key, input_dim):
    ks = jax.random.split(key, 8)
    scale1 = 1.0 / jnp.sqrt(input_dim)
    scale2 = 1.0 / jnp.sqrt(128.0)
    scale3 = 1.0 / jnp.sqrt(64.0)
    return {
        # Linear weights stored as (in, out)  ==  PyTorch W.T
        "w1": jax.random.uniform(ks[0], (input_dim, 128), jnp.float32, -scale1, scale1),
        "b1": jax.random.uniform(ks[1], (1, 128), jnp.float32, -scale1, scale1),
        "g1": jnp.ones((1, 128), jnp.float32),    # BatchNorm1d(128) weight (gamma)
        "bt1": jnp.zeros((1, 128), jnp.float32),  # BatchNorm1d(128) bias (beta)
        "w2": jax.random.uniform(ks[2], (128, 64), jnp.float32, -scale2, scale2),
        "b2": jax.random.uniform(ks[3], (1, 64), jnp.float32, -scale2, scale2),
        "g2": jnp.ones((1, 64), jnp.float32),
        "bt2": jnp.zeros((1, 64), jnp.float32),
        "w3": jax.random.uniform(ks[4], (64, 1), jnp.float32, -scale3, scale3),
        "b3": jax.random.uniform(ks[5], (1, 1), jnp.float32, -scale3, scale3),
    }


def _reference_forward(x, params):
    """Pure-JAX f32 reference with PyTorch training-mode BN semantics."""
    def bn(h, g, b):
        mu = jnp.mean(h, axis=0, keepdims=True)
        var = jnp.mean((h - mu) ** 2, axis=0, keepdims=True)
        return g * (h - mu) * jax.lax.rsqrt(var + EPS) + b

    h = jnp.maximum(x @ params["w1"] + params["b1"], 0.0)
    h = bn(h, params["g1"], params["bt1"])
    h = jnp.maximum(h @ params["w2"] + params["b2"], 0.0)
    h = bn(h, params["g2"], params["bt2"])
    y = h @ params["w3"] + params["b3"]
    return y[:, 0]


if __name__ == "__main__":
    key = jax.random.PRNGKey(0)
    k_param, k_x = jax.random.split(key)

    input_dim = 16
    batch = 8
    params = init_params(k_param, input_dim)
    x = jax.random.normal(k_x, (batch, input_dim), jnp.float32)

    fwd = jax.jit(simple_nn_forward)
    y = fwd(x, params)
    jax.block_until_ready(y)
    assert y.shape == (batch,)

    # Sanity check vs the pure-JAX f32 reference (loose tolerance: layer-2 operands and the
    # resident h1/h2 are bf16; BN uses single-pass batch variance).
    ref = _reference_forward(x, params)
    max_err = float(jnp.max(jnp.abs(y - ref)))
    assert bool(jnp.all(jnp.isfinite(y))) and max_err < 0.2, f"max abs error {max_err}"
    print("KERNEL_OK")
</pallas_src>

<mosaic_0001>
module attributes {stable_mosaic.version = 11 : i64} {
  func.func @_simple_nn_kernel(%arg0: i32, %arg1: i32, %arg2: memref<8x16xf32, #tpu.memory_space<vmem>>, %arg3: memref<16x128xf32, #tpu.memory_space<vmem>>, %arg4: memref<1x128xf32, #tpu.memory_space<vmem>>, %arg5: memref<1x128xf32, #tpu.memory_space<vmem>>, %arg6: memref<1x128xf32, #tpu.memory_space<vmem>>, %arg7: memref<128x64xbf16, #tpu.memory_space<vmem>>, %arg8: memref<1x64xf32, #tpu.memory_space<vmem>>, %arg9: memref<1x64xf32, #tpu.memory_space<vmem>>, %arg10: memref<1x64xf32, #tpu.memory_space<vmem>>, %arg11: memref<1x64xf32, #tpu.memory_space<vmem>>, %arg12: memref<1x1xf32, #tpu.memory_space<vmem>>, %arg13: memref<1x8xf32, #tpu.memory_space<vmem>>, %arg14: memref<8x128xbf16, #tpu.memory_space<vmem>>, %arg15: memref<8x64xbf16, #tpu.memory_space<vmem>>, %arg16: memref<2x128xf32, #tpu.memory_space<vmem>>, %arg17: memref<2x64xf32, #tpu.memory_space<vmem>>) attributes {dimension_semantics = [#tpu.dimension_semantics<arbitrary>, #tpu.dimension_semantics<arbitrary>], iteration_bounds = array<i64: 3, 1>, scalar_prefetch = 0 : i64, scratch_operands = 4 : i64, tpu.core_type = #tpu.core_type<tc>, window_params = [{transform_indices = @transform_0, window_bounds = array<i64: 8, 16>}, {pipeline_mode = #tpu.pipeline_mode<synchronous>, transform_indices = @transform_1, window_bounds = array<i64: 16, 128>}, {pipeline_mode = #tpu.pipeline_mode<synchronous>, transform_indices = @transform_2, window_bounds = array<i64: 1, 128>}, {pipeline_mode = #tpu.pipeline_mode<synchronous>, transform_indices = @transform_3, window_bounds = array<i64: 1, 128>}, {pipeline_mode = #tpu.pipeline_mode<synchronous>, transform_indices = @transform_4, window_bounds = array<i64: 1, 128>}, {pipeline_mode = #tpu.pipeline_mode<synchronous>, transform_indices = @transform_5, window_bounds = array<i64: 128, 64>}, {pipeline_mode = #tpu.pipeline_mode<synchronous>, transform_indices = @transform_6, window_bounds = array<i64: 1, 64>}, {pipeline_mode = #tpu.pipeline_mode<synchronous>, transform_indices = @transform_7, window_bounds = array<i64: 1, 64>}, {pipeline_mode = #tpu.pipeline_mode<synchronous>, transform_indices = @transform_8, window_bounds = array<i64: 1, 64>}, {pipeline_mode = #tpu.pipeline_mode<synchronous>, transform_indices = @transform_9, window_bounds = array<i64: 1, 64>}, {pipeline_mode = #tpu.pipeline_mode<synchronous>, transform_indices = @transform_10, window_bounds = array<i64: 1, 1>}, {transform_indices = @transform_11, window_bounds = array<i64: 1, 8>}]} {
    %c8_i32 = arith.constant 8 : i32
    %0 = arith.muli %arg1, %c8_i32 : i32
    %1 = tpu.assume_multiple %0, 8 : i32
    %c0_i32 = arith.constant 0 : i32
    %2 = arith.cmpi eq, %arg0, %c0_i32 : i32
    %3 = arith.extui %2 : i1 to i32
    %c0_i32_0 = arith.constant 0 : i32
    %4 = arith.cmpi ne, %3, %c0_i32_0 : i32
    scf.if %4 {
      %c0_i32_3 = arith.constant 0 : i32
      %11 = arith.cmpi eq, %arg1, %c0_i32_3 : i32
      %12 = arith.extui %11 : i1 to i32
      %c0_i32_4 = arith.constant 0 : i32
      %13 = arith.cmpi ne, %12, %c0_i32_4 : i32
      scf.if %13 {
        %cst_26 = arith.constant 0.000000e+00 : f32
        %41 = vector.broadcast %cst_26 : f32 to vector<2x128xf32>
        %c0_27 = arith.constant 0 : index
        %c0_28 = arith.constant 0 : index
        %42 = vector.load %arg16[%c0_27, %c0_28] : memref<2x128xf32, #tpu.memory_space<vmem>>, vector<2x128xf32>
        tpu.vector_store %arg16[%c0_27, %c0_28], %41 {strides = array<i32>} : memref<2x128xf32, #tpu.memory_space<vmem>>, vector<2x128xf32>,
        %cst_29 = arith.constant 0.000000e+00 : f32
        %43 = vector.broadcast %cst_29 : f32 to vector<2x64xf32>
        %c0_30 = arith.constant 0 : index
        %c0_31 = arith.constant 0 : index
        %44 = vector.load %arg17[%c0_30, %c0_31] : memref<2x64xf32, #tpu.memory_space<vmem>>, vector<2x64xf32>
        tpu.vector_store %arg17[%c0_30, %c0_31], %43 {strides = array<i32>} : memref<2x64xf32, #tpu.memory_space<vmem>>, vector<2x64xf32>,
      } else {
      }
      %c0 = arith.constant 0 : index
      %c0_5 = arith.constant 0 : index
      %14 = vector.load %arg2[%c0, %c0_5] : memref<8x16xf32, #tpu.memory_space<vmem>>, vector<8x16xf32>
      %c0_6 = arith.constant 0 : index
      %c0_7 = arith.constant 0 : index
      %15 = vector.load %arg3[%c0_6, %c0_7] : memref<16x128xf32, #tpu.memory_space<vmem>>, vector<16x128xf32>
      %cst = arith.constant dense<0.000000e+00> : vector<8x128xf32>
      %16 = tpu.matmul %14, %15, %cst {dimension_numbers = #tpu.dot_dimension_numbers<[1], [0], [0], [1], [0, 0, 1, 1], [], []>} : vector<8x16xf32>, vector<16x128xf32>, vector<8x128xf32> -> vector<8x128xf32>
      %c0_8 = arith.constant 0 : index
      %c0_9 = arith.constant 0 : index
      %17 = vector.load %arg4[%c0_8, %c0_9] : memref<1x128xf32, #tpu.memory_space<vmem>>, vector<1x128xf32>
      %18 = vector.broadcast %17 : vector<1x128xf32> to vector<8x128xf32>
      %19 = arith.addf %16, %18 : vector<8x128xf32>
      %cst_10 = arith.constant 0.000000e+00 : f32
      %20 = vector.broadcast %cst_10 : f32 to vector<8x128xf32>
      %21 = arith.maximumf %19, %20 : vector<8x128xf32>
      %c0_11 = arith.constant 0 : index
      %c0_12 = arith.constant 0 : index
      %22 = vector.load %arg16[%c0_11, %c0_12] : memref<2x128xf32, #tpu.memory_space<vmem>>, vector<1x128xf32>
      %cst_13 = arith.constant dense<0.000000e+00> : vector<128xf32>
      %23 = vector.multi_reduction <add>, %21, %cst_13 [0] : vector<8x128xf32> to vector<128xf32>
      %24 = vector.shape_cast %23 : vector<128xf32> to vector<1x128xf32>
      %25 = arith.addf %22, %24 : vector<1x128xf32>
      %c0_14 = arith.constant 0 : index
      %c0_15 = arith.constant 0 : index
      %26 = vector.load %arg16[%c0_14, %c0_15] : memref<2x128xf32, #tpu.memory_space<vmem>>, vector<1x128xf32>
      tpu.vector_store %arg16[%c0_14, %c0_15], %25 {strides = array<i32>} : memref<2x128xf32, #tpu.memory_space<vmem>>, vector<1x128xf32>,
      %c1 = arith.constant 1 : index
      %c0_16 = arith.constant 0 : index
      %27 = vector.load %arg16[%c1, %c0_16] : memref<2x128xf32, #tpu.memory_space<vmem>>, vector<1x128xf32>
      %28 = arith.mulf %21, %21 : vector<8x128xf32>
      %cst_17 = arith.constant dense<0.000000e+00> : vector<128xf32>
      %29 = vector.multi_reduction <add>, %28, %cst_17 [0] : vector<8x128xf32> to vector<128xf32>
      %30 = vector.shape_cast %29 : vector<128xf32> to vector<1x128xf32>
      %31 = arith.addf %27, %30 : vector<1x128xf32>
      %c1_18 = arith.constant 1 : index
      %c0_19 = arith.constant 0 : index
      %32 = vector.load %arg16[%c1_18, %c0_19] : memref<2x128xf32, #tpu.memory_space<vmem>>, vector<1x128xf32>
      tpu.vector_store %arg16[%c1_18, %c0_19], %31 {strides = array<i32>} : memref<2x128xf32, #tpu.memory_space<vmem>>, vector<1x128xf32>,
      %33 = arith.truncf %21 : vector<8x128xf32> to vector<8x128xbf16>
      %34 = arith.index_cast %1 : i32 to index
      %c0_20 = arith.constant 0 : index
      %35 = vector.load %arg14[%34, %c0_20] : memref<8x128xbf16, #tpu.memory_space<vmem>>, vector<8x128xbf16>
      tpu.vector_store %arg14[%34, %c0_20], %33 {strides = array<i32>} : memref<8x128xbf16, #tpu.memory_space<vmem>>, vector<8x128xbf16>,
      %c0_i32_21 = arith.constant 0 : i32
      %36 = arith.cmpi eq, %arg1, %c0_i32_21 : i32
      %37 = arith.extui %36 : i1 to i32
      %c0_i32_22 = arith.constant 0 : i32
      %38 = arith.cmpi ne, %37, %c0_i32_22 : i32
      scf.if %38 {
        %c0_26 = arith.constant 0 : index
        %c0_27 = arith.constant 0 : index
        %41 = vector.load %arg16[%c0_26, %c0_27] : memref<2x128xf32, #tpu.memory_space<vmem>>, vector<1x128xf32>
        %cst_28 = arith.constant 1.250000e-01 : f32
        %42 = vector.broadcast %cst_28 : f32 to vector<1x128xf32>
        %43 = arith.mulf %41, %42 : vector<1x128xf32>
        %c1_29 = arith.constant 1 : index
        %c0_30 = arith.constant 0 : index
        %44 = vector.load %arg16[%c1_29, %c0_30] : memref<2x128xf32, #tpu.memory_space<vmem>>, vector<1x128xf32>
        %cst_31 = arith.constant 1.250000e-01 : f32
        %45 = vector.broadcast %cst_31 : f32 to vector<1x128xf32>
        %46 = arith.mulf %44, %45 : vector<1x128xf32>
        %47 = arith.mulf %43, %43 : vector<1x128xf32>
        %48 = arith.subf %46, %47 : vector<1x128xf32>
        %cst_32 = arith.constant 0.000000e+00 : f32
        %49 = vector.broadcast %cst_32 : f32 to vector<1x128xf32>
        %50 = arith.maximumf %48, %49 : vector<1x128xf32>
        %c0_33 = arith.constant 0 : index
        %c0_34 = arith.constant 0 : index
        %51 = vector.load %arg5[%c0_33, %c0_34] : memref<1x128xf32, #tpu.memory_space<vmem>>, vector<1x128xf32>
        %cst_35 = arith.constant 9.99999974E-6 : f32
        %52 = vector.broadcast %cst_35 : f32 to vector<1x128xf32>
        %53 = arith.addf %50, %52 : vector<1x128xf32>
        %54 = math.rsqrt %53 : vector<1x128xf32>
        %55 = arith.mulf %51, %54 : vector<1x128xf32>
        %c0_36 = arith.constant 0 : index
        %c0_37 = arith.constant 0 : index
        %56 = vector.load %arg16[%c0_36, %c0_37] : memref<2x128xf32, #tpu.memory_space<vmem>>, vector<1x128xf32>
        tpu.vector_store %arg16[%c0_36, %c0_37], %55 {strides = array<i32>} : memref<2x128xf32, #tpu.memory_space<vmem>>, vector<1x128xf32>,
        %c0_38 = arith.constant 0 : index
        %c0_39 = arith.constant 0 : index
        %57 = vector.load %arg6[%c0_38, %c0_39] : memref<1x128xf32, #tpu.memory_space<vmem>>, vector<1x128xf32>
        %58 = arith.mulf %43, %55 : vector<1x128xf32>
        %59 = arith.subf %57, %58 : vector<1x128xf32>
        %c1_40 = arith.constant 1 : index
        %c0_41 = arith.constant 0 : index
        %60 = vector.load %arg16[%c1_40, %c0_41] : memref<2x128xf32, #tpu.memory_space<vmem>>, vector<1x128xf32>
        tpu.vector_store %arg16[%c1_40, %c0_41], %59 {strides = array<i32>} : memref<2x128xf32, #tpu.memory_space<vmem>>, vector<1x128xf32>,
      } else {
      }
      %cst_23 = arith.constant 0.000000e+00 : f32
      %39 = vector.broadcast %cst_23 : f32 to vector<1x8xf32>
      %c0_24 = arith.constant 0 : index
      %c0_25 = arith.constant 0 : index
      %40 = vector.load %arg13[%c0_24, %c0_25] : memref<1x8xf32, #tpu.memory_space<vmem>>, vector<1x8xf32>
      tpu.vector_store %arg13[%c0_24, %c0_25], %39 {strides = array<i32>} : memref<1x8xf32, #tpu.memory_space<vmem>>, vector<1x8xf32>,
    } else {
    }
    %c1_i32 = arith.constant 1 : i32
    %5 = arith.cmpi eq, %arg0, %c1_i32 : i32
    %6 = arith.extui %5 : i1 to i32
    %c0_i32_1 = arith.constant 0 : i32
    %7 = arith.cmpi ne, %6, %c0_i32_1 : i32
    scf.if %7 {
      %11 = arith.index_cast %1 : i32 to index
      %c0 = arith.constant 0 : index
      %12 = vector.load %arg14[%11, %c0] : memref<8x128xbf16, #tpu.memory_space<vmem>>, vector<8x128xbf16>
      %13 = arith.extf %12 : vector<8x128xbf16> to vector<8x128xf32>
      %c0_3 = arith.constant 0 : index
      %c0_4 = arith.constant 0 : index
      %14 = vector.load %arg16[%c0_3, %c0_4] : memref<2x128xf32, #tpu.memory_space<vmem>>, vector<1x128xf32>
      %15 = vector.broadcast %14 : vector<1x128xf32> to vector<8x128xf32>
      %16 = arith.mulf %13, %15 : vector<8x128xf32>
      %c1 = arith.constant 1 : index
      %c0_5 = arith.constant 0 : index
      %17 = vector.load %arg16[%c1, %c0_5] : memref<2x128xf32, #tpu.memory_space<vmem>>, vector<1x128xf32>
      %18 = vector.broadcast %17 : vector<1x128xf32> to vector<8x128xf32>
      %19 = arith.addf %16, %18 : vector<8x128xf32>
      %20 = arith.truncf %19 : vector<8x128xf32> to vector<8x128xbf16>
      %c0_6 = arith.constant 0 : index
      %c0_7 = arith.constant 0 : index
      %21 = vector.load %arg7[%c0_6, %c0_7] : memref<128x64xbf16, #tpu.memory_space<vmem>>, vector<128x64xbf16>
      %cst = arith.constant dense<0.000000e+00> : vector<8x64xf32>
      %22 = tpu.matmul %20, %21, %cst {dimension_numbers = #tpu.dot_dimension_numbers<[1], [0], [0], [1], [0, 0, 1, 1], [], []>} : vector<8x128xbf16>, vector<128x64xbf16>, vector<8x64xf32> -> vector<8x64xf32>
      %c0_8 = arith.constant 0 : index
      %c0_9 = arith.constant 0 : index
      %23 = vector.load %arg8[%c0_8, %c0_9] : memref<1x64xf32, #tpu.memory_space<vmem>>, vector<1x64xf32>
      %24 = vector.broadcast %23 : vector<1x64xf32> to vector<8x64xf32>
      %25 = arith.addf %22, %24 : vector<8x64xf32>
      %cst_10 = arith.constant 0.000000e+00 : f32
      %26 = vector.broadcast %cst_10 : f32 to vector<8x64xf32>
      %27 = arith.maximumf %25, %26 : vector<8x64xf32>
      %c0_11 = arith.constant 0 : index
      %c0_12 = arith.constant 0 : index
      %28 = vector.load %arg17[%c0_11, %c0_12] : memref<2x64xf32, #tpu.memory_space<vmem>>, vector<1x64xf32>
      %cst_13 = arith.constant dense<0.000000e+00> : vector<64xf32>
      %29 = vector.multi_reduction <add>, %27, %cst_13 [0] : vector<8x64xf32> to vector<64xf32>
      %30 = vector.shape_cast %29 : vector<64xf32> to vector<1x64xf32>
      %31 = arith.addf %28, %30 : vector<1x64xf32>
      %c0_14 = arith.constant 0 : index
      %c0_15 = arith.constant 0 : index
      %32 = vector.load %arg17[%c0_14, %c0_15] : memref<2x64xf32, #tpu.memory_space<vmem>>, vector<1x64xf32>
      tpu.vector_store %arg17[%c0_14, %c0_15], %31 {strides = array<i32>} : memref<2x64xf32, #tpu.memory_space<vmem>>, vector<1x64xf32>,
      %c1_16 = arith.constant 1 : index
      %c0_17 = arith.constant 0 : index
      %33 = vector.load %arg17[%c1_16, %c0_17] : memref<2x64xf32, #tpu.memory_space<vmem>>, vector<1x64xf32>
      %34 = arith.mulf %27, %27 : vector<8x64xf32>
      %cst_18 = arith.constant dense<0.000000e+00> : vector<64xf32>
      %35 = vector.multi_reduction <add>, %34, %cst_18 [0] : vector<8x64xf32> to vector<64xf32>
      %36 = vector.shape_cast %35 : vector<64xf32> to vector<1x64xf32>
      %37 = arith.addf %33, %36 : vector<1x64xf32>
      %c1_19 = arith.constant 1 : index
      %c0_20 = arith.constant 0 : index
      %38 = vector.load %arg17[%c1_19, %c0_20] : memref<2x64xf32, #tpu.memory_space<vmem>>, vector<1x64xf32>
      tpu.vector_store %arg17[%c1_19, %c0_20], %37 {strides = array<i32>} : memref<2x64xf32, #tpu.memory_space<vmem>>, vector<1x64xf32>,
      %39 = arith.truncf %27 : vector<8x64xf32> to vector<8x64xbf16>
      %40 = arith.index_cast %1 : i32 to index
      %c0_21 = arith.constant 0 : index
      %41 = vector.load %arg15[%40, %c0_21] : memref<8x64xbf16, #tpu.memory_space<vmem>>, vector<8x64xbf16>
      tpu.vector_store %arg15[%40, %c0_21], %39 {strides = array<i32>} : memref<8x64xbf16, #tpu.memory_space<vmem>>, vector<8x64xbf16>,
      %c0_i32_22 = arith.constant 0 : i32
      %42 = arith.cmpi eq, %arg1, %c0_i32_22 : i32
      %43 = arith.extui %42 : i1 to i32
      %c0_i32_23 = arith.constant 0 : i32
      %44 = arith.cmpi ne, %43, %c0_i32_23 : i32
      scf.if %44 {
        %c0_27 = arith.constant 0 : index
        %c0_28 = arith.constant 0 : index
        %47 = vector.load %arg17[%c0_27, %c0_28] : memref<2x64xf32, #tpu.memory_space<vmem>>, vector<1x64xf32>
        %cst_29 = arith.constant 1.250000e-01 : f32
        %48 = vector.broadcast %cst_29 : f32 to vector<1x64xf32>
        %49 = arith.mulf %47, %48 : vector<1x64xf32>
        %c1_30 = arith.constant 1 : index
        %c0_31 = arith.constant 0 : index
        %50 = vector.load %arg17[%c1_30, %c0_31] : memref<2x64xf32, #tpu.memory_space<vmem>>, vector<1x64xf32>
        %cst_32 = arith.constant 1.250000e-01 : f32
        %51 = vector.broadcast %cst_32 : f32 to vector<1x64xf32>
        %52 = arith.mulf %50, %51 : vector<1x64xf32>
        %53 = arith.mulf %49, %49 : vector<1x64xf32>
        %54 = arith.subf %52, %53 : vector<1x64xf32>
        %cst_33 = arith.constant 0.000000e+00 : f32
        %55 = vector.broadcast %cst_33 : f32 to vector<1x64xf32>
        %56 = arith.maximumf %54, %55 : vector<1x64xf32>
        %c0_34 = arith.constant 0 : index
        %c0_35 = arith.constant 0 : index
        %57 = vector.load %arg9[%c0_34, %c0_35] : memref<1x64xf32, #tpu.memory_space<vmem>>, vector<1x64xf32>
        %cst_36 = arith.constant 9.99999974E-6 : f32
        %58 = vector.broadcast %cst_36 : f32 to vector<1x64xf32>
        %59 = arith.addf %56, %58 : vector<1x64xf32>
        %60 = math.rsqrt %59 : vector<1x64xf32>
        %61 = arith.mulf %57, %60 : vector<1x64xf32>
        %c0_37 = arith.constant 0 : index
        %c0_38 = arith.constant 0 : index
        %62 = vector.load %arg17[%c0_37, %c0_38] : memref<2x64xf32, #tpu.memory_space<vmem>>, vector<1x64xf32>
        tpu.vector_store %arg17[%c0_37, %c0_38], %61 {strides = array<i32>} : memref<2x64xf32, #tpu.memory_space<vmem>>, vector<1x64xf32>,
        %c0_39 = arith.constant 0 : index
        %c0_40 = arith.constant 0 : index
        %63 = vector.load %arg10[%c0_39, %c0_40] : memref<1x64xf32, #tpu.memory_space<vmem>>, vector<1x64xf32>
        %64 = arith.mulf %49, %61 : vector<1x64xf32>
        %65 = arith.subf %63, %64 : vector<1x64xf32>
        %c1_41 = arith.constant 1 : index
        %c0_42 = arith.constant 0 : index
        %66 = vector.load %arg17[%c1_41, %c0_42] : memref<2x64xf32, #tpu.memory_space<vmem>>, vector<1x64xf32>
        tpu.vector_store %arg17[%c1_41, %c0_42], %65 {strides = array<i32>} : memref<2x64xf32, #tpu.memory_space<vmem>>, vector<1x64xf32>,
      } else {
      }
      %cst_24 = arith.constant 0.000000e+00 : f32
      %45 = vector.broadcast %cst_24 : f32 to vector<1x8xf32>
      %c0_25 = arith.constant 0 : index
      %c0_26 = arith.constant 0 : index
      %46 = vector.load %arg13[%c0_25, %c0_26] : memref<1x8xf32, #tpu.memory_space<vmem>>, vector<1x8xf32>
      tpu.vector_store %arg13[%c0_25, %c0_26], %45 {strides = array<i32>} : memref<1x8xf32, #tpu.memory_space<vmem>>, vector<1x8xf32>,
    } else {
    }
    %c2_i32 = arith.constant 2 : i32
    %8 = arith.cmpi eq, %arg0, %c2_i32 : i32
    %9 = arith.extui %8 : i1 to i32
    %c0_i32_2 = arith.constant 0 : i32
    %10 = arith.cmpi ne, %9, %c0_i32_2 : i32
    scf.if %10 {
      %11 = arith.index_cast %1 : i32 to index
      %c0 = arith.constant 0 : index
      %12 = vector.load %arg15[%11, %c0] : memref<8x64xbf16, #tpu.memory_space<vmem>>, vector<8x64xbf16>
      %13 = arith.extf %12 : vector<8x64xbf16> to vector<8x64xf32>
      %c0_3 = arith.constant 0 : index
      %c0_4 = arith.constant 0 : index
      %14 = vector.load %arg17[%c0_3, %c0_4] : memref<2x64xf32, #tpu.memory_space<vmem>>, vector<1x64xf32>
      %15 = vector.broadcast %14 : vector<1x64xf32> to vector<8x64xf32>
      %16 = arith.mulf %13, %15 : vector<8x64xf32>
      %c1 = arith.constant 1 : index
      %c0_5 = arith.constant 0 : index
      %17 = vector.load %arg17[%c1, %c0_5] : memref<2x64xf32, #tpu.memory_space<vmem>>, vector<1x64xf32>
      %18 = vector.broadcast %17 : vector<1x64xf32> to vector<8x64xf32>
      %19 = arith.addf %16, %18 : vector<8x64xf32>
      %c0_6 = arith.constant 0 : index
      %c0_7 = arith.constant 0 : index
      %20 = vector.load %arg11[%c0_6, %c0_7] : memref<1x64xf32, #tpu.memory_space<vmem>>, vector<1x64xf32>
      %21 = vector.broadcast %20 : vector<1x64xf32> to vector<8x64xf32>
      %22 = arith.mulf %19, %21 : vector<8x64xf32>
      %cst = arith.constant dense<0.000000e+00> : vector<8xf32>
      %23 = vector.multi_reduction <add>, %22, %cst [1] : vector<8x64xf32> to vector<8xf32>
      %24 = vector.shape_cast %23 : vector<8xf32> to vector<1x8xf32>
      %c0_8 = arith.constant 0 : index
      %c0_9 = arith.constant 0 : index
      %25 = vector.load %arg12[%c0_8, %c0_9] : memref<1x1xf32, #tpu.memory_space<vmem>>, vector<1x1xf32>
      %26 = vector.broadcast %25 : vector<1x1xf32> to vector<1x8xf32>
      %27 = arith.addf %24, %26 : vector<1x8xf32>
      %c0_10 = arith.constant 0 : index
      %c0_11 = arith.constant 0 : index
      %28 = vector.load %arg13[%c0_10, %c0_11] : memref<1x8xf32, #tpu.memory_space<vmem>>, vector<1x8xf32>
      tpu.vector_store %arg13[%c0_10, %c0_11], %27 {strides = array<i32>} : memref<1x8xf32, #tpu.memory_space<vmem>>, vector<1x8xf32>,
    } else {
    }
    return
  }
  func.func @transform_0(%arg0: i32, %arg1: i32) -> (i32, i32) {
    %c1_i32 = arith.constant 1 : i32
    %0 = arith.minsi %arg0, %c1_i32 : i32
    %c1_i32_0 = arith.constant 1 : i32
    %1 = arith.subi %c1_i32_0, %0 : i32
    %2 = arith.muli %arg1, %1 : i32
    %c0_i32 = arith.constant 0 : i32
    %c0_i32_1 = arith.constant 0 : i32
    return %2, %c0_i32 : i32, i32
  }
  func.func @transform_1(%arg0: i32, %arg1: i32) -> (i32, i32) {
    %c0_i32 = arith.constant 0 : i32
    %c0_i32_0 = arith.constant 0 : i32
    %c0_i32_1 = arith.constant 0 : i32
    return %c0_i32, %c0_i32_0 : i32, i32
  }
  func.func @transform_2(%arg0: i32, %arg1: i32) -> (i32, i32) {
    %c0_i32 = arith.constant 0 : i32
    %c0_i32_0 = arith.constant 0 : i32
    %c0_i32_1 = arith.constant 0 : i32
    return %c0_i32, %c0_i32_0 : i32, i32
  }
  func.func @transform_3(%arg0: i32, %arg1: i32) -> (i32, i32) {
    %c0_i32 = arith.constant 0 : i32
    %c0_i32_0 = arith.constant 0 : i32
    %c0_i32_1 = arith.constant 0 : i32
    return %c0_i32, %c0_i32_0 : i32, i32
  }
  func.func @transform_4(%arg0: i32, %arg1: i32) -> (i32, i32) {
    %c0_i32 = arith.constant 0 : i32
    %c0_i32_0 = arith.constant 0 : i32
    %c0_i32_1 = arith.constant 0 : i32
    return %c0_i32, %c0_i32_0 : i32, i32
  }
  func.func @transform_5(%arg0: i32, %arg1: i32) -> (i32, i32) {
    %c0_i32 = arith.constant 0 : i32
    %c0_i32_0 = arith.constant 0 : i32
    %c0_i32_1 = arith.constant 0 : i32
    return %c0_i32, %c0_i32_0 : i32, i32
  }
  func.func @transform_6(%arg0: i32, %arg1: i32) -> (i32, i32) {
    %c0_i32 = arith.constant 0 : i32
    %c0_i32_0 = arith.constant 0 : i32
    %c0_i32_1 = arith.constant 0 : i32
    return %c0_i32, %c0_i32_0 : i32, i32
  }
  func.func @transform_7(%arg0: i32, %arg1: i32) -> (i32, i32) {
    %c0_i32 = arith.constant 0 : i32
    %c0_i32_0 = arith.constant 0 : i32
    %c0_i32_1 = arith.constant 0 : i32
    return %c0_i32, %c0_i32_0 : i32, i32
  }
  func.func @transform_8(%arg0: i32, %arg1: i32) -> (i32, i32) {
    %c0_i32 = arith.constant 0 : i32
    %c0_i32_0 = arith.constant 0 : i32
    %c0_i32_1 = arith.constant 0 : i32
    return %c0_i32, %c0_i32_0 : i32, i32
  }
  func.func @transform_9(%arg0: i32, %arg1: i32) -> (i32, i32) {
    %c0_i32 = arith.constant 0 : i32
    %c0_i32_0 = arith.constant 0 : i32
    %c0_i32_1 = arith.constant 0 : i32
    return %c0_i32, %c0_i32_0 : i32, i32
  }
  func.func @transform_10(%arg0: i32, %arg1: i32) -> (i32, i32) {
    %c0_i32 = arith.constant 0 : i32
    %c0_i32_0 = arith.constant 0 : i32
    %c0_i32_1 = arith.constant 0 : i32
    return %c0_i32, %c0_i32_0 : i32, i32
  }
  func.func @transform_11(%arg0: i32, %arg1: i32) -> (i32, i32) {
    %c0_i32 = arith.constant 0 : i32
    %c0_i32_0 = arith.constant 0 : i32
    return %c0_i32, %arg1 : i32, i32
  }
}

</mosaic_0001>

<bundles_post_ra>
// kernel: simple_nn_forward.1
= control target key start
LH: loop header
LB: loop body
LE: loop exit
PB: predicated region body
PF: predicated region fallthrough
CT: control target
= control target key end

     0   :  { %s1099_s0 = inlined_call_operand.vmem [shape: f32[8,16], index: 0, kind: input, shape index: {}]   ;;  %s1100_s1 = inlined_call_operand.vmem [shape: f32[16,128], index: 1, kind: input, shape index: {}]   ;;  %s1101_s2 = inlined_call_operand.vmem [shape: f32[1,128], index: 2, kind: input, shape index: {}]   ;;  %s1102_s3 = inlined_call_operand.vmem [shape: f32[1,128], index: 3, kind: input, shape index: {}]   ;;  %s1103_s4 = inlined_call_operand.vmem [shape: f32[1,128], index: 4, kind: input, shape index: {}]   ;;  %s1104_s5 = inlined_call_operand.vmem [shape: bf16[128,64], index: 5, kind: input, shape index: {}]   ;;  %s1105_s6 = inlined_call_operand.vmem [shape: f32[1,64], index: 6, kind: input, shape index: {}]   ;;  %s1106_s7 = inlined_call_operand.vmem [shape: f32[1,64], index: 7, kind: input, shape index: {}]   ;;  %s1107_s8 = inlined_call_operand.vmem [shape: f32[1,64], index: 8, kind: input, shape index: {}]   ;;  %s1108_s9 = inlined_call_operand.vmem [shape: f32[1,64], index: 9, kind: input, shape index: {}]   ;;  %s1109_s10 = inlined_call_operand.<no memory space> [shape: f32[1,1], index: 10, kind: input, shape index: {}]   ;;  %s1110_s11 = inlined_call_operand.hbm [shape: f32[1,8], index: 11, kind: output, shape index: {}]  }
   0x1   :  { %v16_v0 = vstv %s1109_s10 }
   0x2   :  { %17 = vst [vmem:[#allocation6] sm:$0x1] %v16_v0 }
   0x3   :  { %18 = vsyncpa [#allocation8], 0  ;;  %s1003_s19 = smov 0   ;;  %s1005_s20 = smov 0  }
   0x4   :  { %s1007_s21 = smov 0  }
   0x5 LB: > { %s781_s10 = sadd.s32 4294967295, %s934_s21   ;;  %s36_s22 = sadd.s32 1, %s930_s20  ;;  %s934_s21 = sphi %s1007_s21, %s24_s21   ;;  %s930_s20 = sphi %s1005_s20, %s1112_s20   ;;  %s926_s19 = sphi %s1003_s19, %s1111_s19  }
   0x6   : > { %p38_p0 = scmp.ge.s32.totalorder %s36_s22, 3  ;;  %p785_p1 = scmp.ge.s32.totalorder %s934_s21, 1 }
   0x7   : > { %p367_p2 = scmp.lt.s32.totalorder %s934_s21, 4 }
   0x8   : > { %s1114_s22 = smov (%p38_p0, %s36_s22), 0 }
   0x9   : > { %p368_p3 = pnand %p785_p1, %p367_p2 }
   0xa   : > { %p786_p4 = scmp.ne.s32.totalorder (!%p368_p3), %s926_s19, 0 }
   0xb   : > { %371 = sbr.rel (%p368_p3) target bundleno = 617 (0x269), region = 64 }
  0x10   : > { %421 = sbr.rel (%p786_p4) target bundleno = 212 (0xd4), region = 68 }
  0x15   : > { %v431_v1 = vld [vmem:[%s1100_s1 + $0x8] sm:$0xff]  ;;  %v430_v2 = vld [vmem:[%s1100_s1] sm:$0xff]  ;;  %vm427_vm0 = vcmask 517120   ;;  %vm436_vm1 = vcmask 130048   ;;  %v936_v4 = vmov 0.0   ;;  %vm514_vm2 = vcmask 57344  }
  0x16   : > { %454 = vmatpush.msra.mxu0 %v431_v1  ;;  %v429_v3 = vld [vmem:[%s1099_s0] sm:$0xff]  ;;  %426 = vst [vmem:[#allocation4] sm:$0x3] %v936_v4 }
  0x17   : > { %428 = vst.msk [vmem:[#allocation5] sm:$0x3] %vm427_vm0, %v936_v4  ;;  %v868_v5 = vld [vmem:[%s1101_s2] ss:$0 sm:$0xff] }
  0x18   : > { %455 = vmatpush.msra.mxu0 %v430_v2  ;;  %515 = vst.msk [vmem:[#allocation7] sm:$0x1] %vm514_vm2, %v936_v4  ;;  %v496_v40 = vld [vmem:[%s1102_s3] sm:$0x1] }
  0x19   : > { %787 = vmatmul.msk.f32.vlgmr.msra.gmra.mxu0 %vm436_vm1, %v429_v3  ;;  %v510_v44 = vld [vmem:[%s1103_s4] sm:$0x1] }
  0x1d   : > { %v461_v20 = vld [vmem:[#allocation4] sm:$0x1]  ;;  %v470_v23 = vld [vmem:[#allocation4 + $0x1] sm:$0x1] }
  0x96   : > { %v457_v6 = vpop.f32.mrf.mxu0 }
  0x97   : > { %v458_v7 = vadd.f32 %v868_v5, %v457_v6 }
  0x99   : > { %v460_v8 = vmax.f32 %v458_v7, 0.0 }
  0x9b   : > { %v462_v9 = vrot.slane %v460_v8, 4  ;;  %v471_v10 = vmul.f32 %v460_v8, %v460_v8  ;;  %v480_v11 = vpack.c.bf16 %v460_v8, %v460_v8 }
  0x9d   : > { %v463_v12 = vadd.f32 %v462_v9, %v460_v8  ;;  %v472_v13 = vrot.slane %v471_v10, 4  ;;  %485 = vst [vmem:[#allocation2] sm:$0xf] %v480_v11 }
  0x9f   : > { %v464_v14 = vrot.slane %v463_v12, 2  ;;  %v473_v15 = vadd.f32 %v472_v13, %v471_v10 }
  0xa1   : > { %v465_v16 = vadd.f32 %v464_v14, %v463_v12  ;;  %v474_v17 = vrot.slane %v473_v15, 2 }
  0xa3   : > { %v466_v18 = vrot.slane %v465_v16, 1  ;;  %v475_v19 = vadd.f32 %v474_v17, %v473_v15 }
  0xa5   : > { %v467_v21 = vadd.f32 %v466_v18, %v465_v16  ;;  %v476_v22 = vrot.slane %v475_v19, 1 }
  0xa7   : > { %v468_v24 = vadd.f32 %v467_v21, %v461_v20  ;;  %v477_v25 = vadd.f32 %v476_v22, %v475_v19 }
  0xa9   : > { %469 = vst [vmem:[#allocation4] sm:$0x1] %v468_v24  ;;  %v478_v26 = vadd.f32 %v477_v25, %v470_v23 }
  0xab   : > { %479 = vst [vmem:[#allocation4 + $0x1] sm:$0x1] %v478_v26 }
  0xb0   : > { %v489_v27 = vld [vmem:[#allocation4] sm:$0x1] }
  0xb1   : > { %v490_v28 = vmul.f32 0.125, %v489_v27 }
  0xb2   : > { %v491_v29 = vld [vmem:[#allocation4 + $0x1] sm:$0x1] }
  0xb3   : > { %v492_v30 = vmul.f32 0.125, %v491_v29  ;;  %v493_v31 = vmul.f32 %v490_v28, %v490_v28 }
  0xb5   : > { %v494_v32 = vsub.f32 %v492_v30, %v493_v31 }
  0xb7   : > { %v495_v33 = vmax.f32 %v494_v32, 0.0 }
  0xb9   : > { %v497_v34 = vadd.f32 1e-05, %v495_v33 }
  0xbb   : > { %869 = vrsqrt.f32 %v497_v34  ;;  %vm504_vm4 = vweird.f32 %v497_v34 }
  0xc1   : > { %v870_v35 = vpop.eup %869 }
  0xc2   : > { %v499_v36 = vmul.f32 %v870_v35, %v497_v34  ;;  %vm505_vm3 = vweird.f32 %v870_v35 }
  0xc3   : > { %vm506_vm5 = vmor %vm504_vm4, %vm505_vm3 }
  0xc4   : > { %v500_v37 = vmul.f32 %v870_v35, %v499_v36 }
  0xc6   : > { %v501_v38 = vmul.f32 0.5, %v500_v37 }
  0xc8   : > { %v502_v39 = vsub.f32 1.5, %v501_v38 }
  0xca   : > { %v503_v41 = vmul.f32 %v870_v35, %v502_v39 }
  0xcc   : > { %v507_v42 = vsel %vm506_vm5, %v870_v35, %v503_v41 }
  0xcd   : > { %v508_v43 = vmul.f32 %v507_v42, %v496_v40 }
  0xcf   : > { %509 = vst [vmem:[#allocation4] sm:$0x1] %v508_v43  ;;  %v511_v45 = vmul.f32 %v508_v43, %v490_v28 }
  0xd1   : > { %v512_v46 = vsub.f32 %v510_v44, %v511_v45 }
  0xd3   : > { %513 = vst [vmem:[#allocation4 + $0x1] sm:$0x1] %v512_v46 }
  0xd4 PF: > { %p788_p5 = scmp.ne.s32.totalorder %s926_s19, 1 }
  0xd6   : > { %519 = sbr.rel (%p788_p5) target bundleno = 439 (0x1b7), region = 80 }
  0xdb   : > { %v833_v47 = vld [vmem:[%s1104_s5 + $0x38] sm:$0xff]  ;;  %v832_v48 = vld [vmem:[%s1104_s5 + $0x30] sm:$0xff]  ;;  %v831_v49 = vld [vmem:[%s1104_s5 + $0x28] sm:$0xff]  ;;  %vm616_vm6 = vcmask 523264   ;;  %vm641_vm7 = vcmask 519168   ;;  %vm625_vm8 = vcmask 516096  }
  0xdc   : > { %601 = vmatpush.bf16.msra.mxu0 %v833_v47  ;;  %v830_v50 = vld [vmem:[%s1104_s5 + $0x20] sm:$0xff]  ;;  %v829_v51 = vld [vmem:[%s1104_s5 + $0x18] sm:$0xff]  ;;  %v871_v54 = vld [vmem:[#allocation4] ss:$0 sm:$0xff]  ;;  %vm672_vm9 = vcmask 57344   ;;  %v937_v28 = vmov 0.0  }
  0xdd   : > { %v524_v52 = vld [vmem:[#allocation2] sm:$0xf]  ;;  %v828_v55 = vld [vmem:[%s1104_s5 + $0x10] sm:$0xff]  ;;  %v872_v57 = vld [vmem:[#allocation4 + $0x1] ss:$0 sm:$0xff] }
  0xde   : > { %v525_v53 = vunpack.c.l.bf16 %v524_v52  ;;  %v827_v58 = vld [vmem:[%s1104_s5 + $0x8] sm:$0xff]  ;;  %v826_v60 = vld [vmem:[%s1104_s5] sm:$0xff]  ;;  %673 = vst.msk [vmem:[#allocation7] sm:$0x1] %vm672_vm9, %v937_v28 }
  0xdf   : > { %v873_v62 = vld [vmem:[%s1105_s6] ss:$0 sm:$0xff]  ;;  %v615_v16 = vld [vmem:[#allocation5] sm:$0x1]  ;;  %v627_v19 = vld [vmem:[#allocation5 + $0x1] sm:$0x1] }
  0xe0   : > { %602 = vmatpush.bf16.msra.mxu0 %v832_v48  ;;  %v528_v56 = vmul.f32 %v871_v54, %v525_v53  ;;  %v654_v37 = vld [vmem:[%s1106_s7] sm:$0x1] }
  0xe1   : > { %v668_v41 = vld [vmem:[%s1107_s8] sm:$0x1] }
  0xe2   : > { %v531_v59 = vadd.f32 %v872_v57, %v528_v56 }
  0xe4   : > { %603 = vmatpush.bf16.msra.mxu0 %v831_v49  ;;  %v532_v61 = vpack.c.bf16 %v531_v59, %v531_v59 }
  0xe8   : > { %604 = vmatpush.bf16.msra.mxu0 %v830_v50 }
  0xec   : > { %605 = vmatpush.bf16.msra.mxu0 %v829_v51 }
  0xf0   : > { %606 = vmatpush.bf16.msra.mxu0 %v828_v55 }
  0xf4   : > { %607 = vmatpush.bf16.msra.mxu0 %v827_v58 }
  0xf8   : > { %608 = vmatpush.bf16.msra.mxu0 %v826_v60 }
  0xfb   : > { %609 = vmatmul.bf16.vlgmr.msra.gmra.mxu0 %v532_v61 }
 0x178   : > { %v610_v63 = vpop.f32.mrf.mxu0 }
 0x179   : > { %v611_v0 = vadd.f32 %v873_v62, %v610_v63 }
 0x17b   : > { %v614_v1 = vmax.f32 %v611_v0, 0.0 }
 0x17d   : > { %v617_v2 = vsel %vm616_vm6, %v614_v1, 0.0  ;;  %v628_v3 = vmul.f32 %v614_v1, %v614_v1  ;;  %v638_v4 = vpack.c.bf16 %v614_v1, %v614_v1 }
 0x17e   : > { %v618_v5 = vrot.slane %v617_v2, 4 }
 0x17f   : > { %v629_v6 = vsel %vm616_vm6, %v628_v3, 0.0  ;;  %642 = vst.msk [vmem:[#allocation3] sm:$0xf] %vm641_vm7, %v638_v4 }
 0x180   : > { %v619_v7 = vadd.f32 %v618_v5, %v617_v2  ;;  %v630_v8 = vrot.slane %v629_v6, 4  ;;  %v612_v9 = vpop.f32.mrf.mxu0 }
 0x182   : > { %v620_v10 = vrot.slane %v619_v7, 2  ;;  %v631_v11 = vadd.f32 %v630_v8, %v629_v6 }
 0x184   : > { %v621_v12 = vadd.f32 %v620_v10, %v619_v7  ;;  %v632_v13 = vrot.slane %v631_v11, 2 }
 0x186   : > { %v622_v14 = vrot.slane %v621_v12, 1  ;;  %v633_v15 = vadd.f32 %v632_v13, %v631_v11 }
 0x188   : > { %v623_v17 = vadd.f32 %v622_v14, %v621_v12  ;;  %v634_v18 = vrot.slane %v633_v15, 1 }
 0x18a   : > { %v624_v20 = vadd.f32 %v623_v17, %v615_v16  ;;  %v635_v21 = vadd.f32 %v634_v18, %v633_v15 }
 0x18c   : > { %626 = vst.msk [vmem:[#allocation5] sm:$0x1] %vm625_vm8, %v624_v20  ;;  %v636_v22 = vadd.f32 %v635_v21, %v627_v19 }
 0x18e   : > { %637 = vst.msk [vmem:[#allocation5 + $0x1] sm:$0x1] %vm625_vm8, %v636_v22 }
 0x193   : > { %v647_v23 = vld [vmem:[#allocation5] sm:$0x1] }
 0x194   : > { %v648_v24 = vmul.f32 0.125, %v647_v23 }
 0x195   : > { %v649_v25 = vld [vmem:[#allocation5 + $0x1] sm:$0x1] }
 0x196   : > { %v650_v26 = vmul.f32 0.125, %v649_v25  ;;  %v651_v27 = vmul.f32 %v648_v24, %v648_v24 }
 0x198   : > { %v652_v29 = vsub.f32 %v650_v26, %v651_v27 }
 0x19a   : > { %v653_v30 = vmax.f32 %v652_v29, 0.0 }
 0x19c   : > { %v655_v31 = vadd.f32 1e-05, %v653_v30 }
 0x19e   : > { %874 = vrsqrt.f32 %v655_v31  ;;  %vm662_vm11 = vweird.f32 %v655_v31 }
 0x1a4   : > { %v875_v32 = vpop.eup %874 }
 0x1a5   : > { %v657_v33 = vmul.f32 %v875_v32, %v655_v31  ;;  %vm663_vm10 = vweird.f32 %v875_v32 }
 0x1a6   : > { %vm664_vm12 = vmor %vm662_vm11, %vm663_vm10 }
 0x1a7   : > { %v658_v34 = vmul.f32 %v875_v32, %v657_v33 }
 0x1a9   : > { %v659_v35 = vmul.f32 0.5, %v658_v34 }
 0x1ab   : > { %v660_v36 = vsub.f32 1.5, %v659_v35 }
 0x1ad   : > { %v661_v38 = vmul.f32 %v875_v32, %v660_v36 }
 0x1af   : > { %v665_v39 = vsel %vm664_vm12, %v875_v32, %v661_v38 }
 0x1b0   : > { %v666_v40 = vmul.f32 %v665_v39, %v654_v37 }
 0x1b2   : > { %667 = vst.msk [vmem:[#allocation5] sm:$0x1] %vm625_vm8, %v666_v40  ;;  %v669_v42 = vmul.f32 %v666_v40, %v648_v24 }
 0x1b4   : > { %v670_v43 = vsub.f32 %v668_v41, %v669_v42 }
 0x1b6   : > { %671 = vst.msk [vmem:[#allocation5 + $0x1] sm:$0x1] %vm625_vm8, %v670_v43 }
 0x1b7 PF: > { %p821_p6 = scmp.ne.s32.totalorder %s926_s19, 2 }
 0x1b9   : > { %677 = sbr.rel (%p821_p6) target bundleno = 611 (0x263), region = 88 }
 0x1be   : > { %v699_v44 = vld [vmem:[#allocation6] sm:$0x1]  ;;  %v938_v45 = vmov 0   ;;  %v682_v46 = vld [vmem:[#allocation3] sm:$0xf]  ;;  %vm695_vm13 = vcmask 523264   ;;  %v708_v56 = vlaneseq }
 0x1bf   : > { %876 = vset.pattern.permute.xlu0 %v938_v45  ;;  %v683_v47 = vunpack.c.l.bf16 %v682_v46  ;;  %v877_v48 = vld [vmem:[#allocation5] ss:$0 sm:$0xff]  ;;  %v878_v50 = vld [vmem:[#allocation5 + $0x1] ss:$0 sm:$0xff]  ;;  %v879_v52 = vld [vmem:[%s1108_s9] ss:$0 sm:$0xff] }
 0x1c0   : > { %702 = vperm.xlu0 %876, %v699_v44   ;;  %v709_v58 = vand.u32 127, %v708_v56  ;;  %vm712_vm14 = vcmask 57344  }
 0x1c1   : > { %v686_v49 = vmul.f32 %v877_v48, %v683_v47 }
 0x1c3   : > { %v689_v51 = vadd.f32 %v878_v50, %v686_v49 }
 0x1c5   : > { %v694_v53 = vmul.f32 %v879_v52, %v689_v51 }
 0x1c7   : > { %v696_v54 = vsel %vm695_vm13, %v694_v53, 0.0 }
 0x1ea   : > { %697 = vadd.xlane.f32.xlu0 %v696_v54 }
 0x232   : > { %v703_v55 = vpop.permute.xlu0 %702 }
 0x233   : > { %v705_v57 = vperm.slane %v703_v55, 0 }
 0x25d   : > { %v698_v59 = vpop.xlane.xlu0 %697 }
 0x25e   : > { %v706_v60 = vadd.f32 %v705_v57, %v698_v59 }
 0x260   : > { %v710_v61 = vperm.slane %v706_v60, %v709_v58 }
 0x262   : > { %713 = vst.msk [vmem:[#allocation7] sm:$0x1] %vm712_vm14, %v710_v61 }
 0x263 PF: > { %p838_p7 = scmp.eq.s32.totalorder %s781_s10, 2  ;;  %s723_s30 = sshll.u32 %s1110_s11, 4  ;;  %s724_s30 = int_to_ptr.hbm [resolvable:$true] %s723_s30 }
 0x264   : > { %s939_s12 = smov [#allocation7]  }
 0x265   : > { %s721_s13 = sshll.u32 %s939_s12, 4  ;;  %s722_s13 = int_to_ptr.vmem [resolvable:$true] %s721_s13 }
 0x266   : > { %835 = dma.vmem_to_hbm [thread:$0]  (%p838_p7), %s722_s13, 16, %s724_s30, [#allocation8]  }
 0x267   : > { %921 = dma.done.wait (%p838_p7), [#allocation8], 16  }
 0x268   : > { %923 = vsyncadd (%p838_p7), [#allocation8], 4294967280 }
 0x269 PF: > { %s24_s21 = sadd.s32 1, %s934_s21   ;;  %s1111_s19 = smov %s930_s20 }
 0x26a   : > { %p21_p8 = scmp.ge.s32.totalorder %s24_s21, 5   ;;  %s1112_s20 = smov %s1114_s22 }
 0x26c   :  { %23 = sbr.rel (!%p21_p8) target bundleno = 5 (0x5), region = 120 }
 0x271   :  { %737 = vsyncpa [#allocation8], 1 }
 0x272   :  { %739 = vsyncpa [#allocation8 + $0x1], 1 }

</bundles_post_ra>
